<compile_context>
chip_gen: v7x
topology: tpu7x:2x2x1
jax: 0.10.0
libtpu: 0.0.40
codegen_flags: <defaults>
</compile_context>

<pallas_src>
import functools

import jax
import jax.numpy as jnp
from jax.experimental import pallas as pl
from jax.experimental.pallas import tpu as pltpu


LN_EPS = 1e-5  # embedding_cfg['in_emb_ln_eps']


def _round_up(x, m):
    return (x + m - 1) // m * m


def _cdiv(a, b):
    return (a + b - 1) // b


def _input_embeddings_kernel(ids_ref, x_ref, w_ref, pos_tab_ref, cst_ref,
                             o_ref, *, eps):
    # Patch projection on the MXU: f32 rows cast to bf16 in-register (no
    # wrapper-side bf16 copy of x in HBM), accumulated in f32.
    x = x_ref[...].astype(jnp.bfloat16)
    y = jnp.dot(x, w_ref[...], preferred_element_type=jnp.float32)

    # Positional-embedding gather as a bf16 one-hot matmul on the MXU
    # (one-hot is exact in bf16; avoids the slow/emulated f32 MXU path).
    max_embeds = pos_tab_ref.shape[0]
    ids = jnp.clip(ids_ref[...], 0, max_embeds - 1)          # (tm, 1) int32
    tm = ids.shape[0]
    iota = jax.lax.broadcasted_iota(jnp.int32, (tm, max_embeds), 1)
    onehot = (iota == ids).astype(jnp.bfloat16)              # (tm, max_embeds)
    pos = jnp.dot(onehot, pos_tab_ref[...],
                  preferred_element_type=jnp.float32)        # (tm, llm_dim)

    bias = cst_ref[0:1, :]
    gamma = cst_ref[1:2, :]
    beta = cst_ref[2:3, :]

    # Bias + positional add, then LayerNorm over llm_dim -- all in f32
    # (keep the epilogue f32: v5e has no bf16 VPU/EUP).
    y = y + bias + pos

    # One-pass stats: var = E[y^2] - mean^2 (halves cross-lane XLU reductions).
    d = y.shape[-1]
    s1 = jnp.sum(y, axis=-1, keepdims=True)
    s2 = jnp.sum(y * y, axis=-1, keepdims=True)
    mean = s1 / d
    var = jnp.maximum(s2 / d - mean * mean, 0.0)
    out = (y - mean) * jax.lax.rsqrt(var + eps) * gamma + beta

    # Dropout: nn.Dropout in eval mode (or Identity) is a no-op.
    # TODO(synk): training-mode dropout (pltpu.prng_random_bits mask) not wired.
    o_ref[...] = out.astype(o_ref.dtype)


def input_embeddings(x, position_ids, params, *, tm=None, ln_eps=LN_EPS,
                     out_dtype=jnp.bfloat16):
    """
    x:            (seq_len, num_patches, 3, H, W) float32
    position_ids: (seq_len, num_patches) int32, values in [0, max_embeds)
    returns:      (seq_len, num_patches, llm_dim) out_dtype
    """
    w = params["patch_w"]            # (patch_dim, llm_dim)
    b = params["patch_b"]            # (1, llm_dim)
    pos_table = params["pos_table"]  # (max_embeds, llm_dim)
    gamma = params["ln_gamma"]       # (1, llm_dim)
    beta = params["ln_beta"]         # (1, llm_dim)

    S, P = x.shape[0], x.shape[1]
    patch_dim = x.shape[2] * x.shape[3] * x.shape[4]
    llm_dim = w.shape[1]
    max_embeds = pos_table.shape[0]
    N = S * P

    # Lane-dense output is the biggest store-path lever; require alignment.
    assert llm_dim % 128 == 0, "llm_dim must be a multiple of 128 (lane-dense)"
    # TODO(synk): pad llm_dim + masked LayerNorm for non-128-aligned dims.

    # --- VMEM capacity (generation-aware tiling / limit) --------------------
    vmem_cap = 64 << 20  # conservative fallback = v7x per-TensorCore VMEM
    try:
        vmem_cap = int(getattr(pltpu.get_tpu_info(),
                               "vmem_capacity_bytes", vmem_cap))
    except Exception:
        pass

    if tm is None:
        if vmem_cap <= (64 << 20):            # v7x: keep f32 epilogue temps small
            tm = 128 if llm_dim >= 2048 else 256
        else:                                 # v5e / v6e: 128 MiB VMEM
            tm = 256 if llm_dim >= 2048 else 512
    assert tm % 32 == 0, "row tile must be a multiple of 32 (sublane packing)"

    # Row tile: big enough to feed the MXU; for small N, split into >= 2 tiles
    # so ("parallel",) can still shard across both TensorCores on v7x.
    rows32 = _round_up(N, 32)
    tm_eff = max(32, min(tm, rows32))
    if rows32 >= 64:
        tm_eff = max(32, min(tm_eff, _round_up((rows32 + 1) // 2, 32)))
    grid = _cdiv(N, tm_eff)                   # boundary block clamped by Pallas

    # --- wrapper-side glue: layout-only, no bf16/pad copy of x --------------
    x_flat = x.reshape(N, patch_dim)                          # stays f32
    ids2d = position_ids.reshape(N, 1).astype(jnp.int32)
    w_bf = w.astype(jnp.bfloat16)                             # small weight cast
    pos_bf = pos_table.astype(jnp.bfloat16)
    consts = jnp.concatenate([b.reshape(1, llm_dim),
                              gamma.reshape(1, llm_dim),
                              beta.reshape(1, llm_dim)],
                             axis=0).astype(jnp.float32)      # (3, llm_dim)

    out_isz = jnp.dtype(out_dtype).itemsize

    # Advisory cost estimate for XLA's scheduler.
    cost = pl.CostEstimate(
        flops=2 * N * patch_dim * llm_dim + 2 * N * max_embeds * llm_dim,
        transcendentals=N,  # one rsqrt per row
        bytes_accessed=(x_flat.size * 4 + ids2d.size * 4 + w_bf.size * 2
                        + pos_bf.size * 2 + consts.size * 4
                        + N * llm_dim * out_isz),
    )

    # VMEM budget: double-buffered streaming blocks, single-buffered constants,
    # f32 epilogue temporaries; clamp to ~80% of physical per-core VMEM.
    vmem_needed = (
        2 * tm_eff * patch_dim * 4                       # x block (f32)
        + 2 * tm_eff * 128 * 4                           # ids block (lane-padded)
        + 1 * patch_dim * llm_dim * 2                    # W (bf16, single buf)
        + 1 * _round_up(max_embeds, 16) * llm_dim * 2    # pos table (bf16)
        + 1 * 8 * llm_dim * 4                            # fused bias/gamma/beta
        + 2 * tm_eff * llm_dim * out_isz                 # out block
        + 4 * tm_eff * llm_dim * 4                       # f32 epilogue temps
        + tm_eff * _round_up(max_embeds, 128) * 2        # one-hot operand
        + (4 << 20))
    vmem_limit = int(min(max(vmem_needed, 16 << 20), (vmem_cap * 4) // 5))

    def build_call(single_buffer_consts):
        def const_spec(shape):
            index_map = lambda i, _n=len(shape): (0,) * _n
            if single_buffer_consts:
                try:
                    return pl.BlockSpec(shape, index_map,
                                        pipeline_mode=pl.Buffered(1))
                except TypeError:  # older jax without pipeline_mode kwarg
                    pass
            return pl.BlockSpec(shape, index_map)

        return pl.pallas_call(
            functools.partial(_input_embeddings_kernel, eps=ln_eps),
            out_shape=jax.ShapeDtypeStruct((N, llm_dim), out_dtype),
            grid_spec=pltpu.PrefetchScalarGridSpec(
                num_scalar_prefetch=0,
                grid=(grid,),
                in_specs=[
                    pl.BlockSpec((tm_eff, 1), lambda i: (i, 0)),         # ids
                    pl.BlockSpec((tm_eff, patch_dim), lambda i: (i, 0)),  # x
                    const_spec((patch_dim, llm_dim)),                    # W
                    const_spec((max_embeds, llm_dim)),                   # pos tbl
                    const_spec((3, llm_dim)),                            # b/g/beta
                ],
                out_specs=pl.BlockSpec((tm_eff, llm_dim), lambda i: (i, 0)),
            ),
            compiler_params=pltpu.CompilerParams(
                dimension_semantics=("parallel",),
                vmem_limit_bytes=vmem_limit),
            cost_estimate=cost,
        )

    try:
        out = build_call(True)(ids2d, x_flat, w_bf, pos_bf, consts)
    except Exception:
        # Fallback: some jax versions don't lower Buffered(1) on pallas_call
        # inputs; retry with default (double-buffered) constant operands.
        out = build_call(False)(ids2d, x_flat, w_bf, pos_bf, consts)

    return out.reshape(S, P, llm_dim)


def init_params(key, patch_dim, llm_dim, max_embeds):
    k1, k2, k3 = jax.random.split(key, 3)
    scale = 1.0 / jnp.sqrt(jnp.float32(patch_dim))
    return {
        "patch_w": jax.random.normal(k1, (patch_dim, llm_dim), jnp.float32) * scale,
        "patch_b": jax.random.normal(k2, (1, llm_dim), jnp.float32) * 0.01,
        "pos_table": jax.random.normal(k3, (max_embeds, llm_dim), jnp.float32) * 0.02,
        "ln_gamma": jnp.ones((1, llm_dim), jnp.float32),
        "ln_beta": jnp.zeros((1, llm_dim), jnp.float32),
    }


def _reference(x, position_ids, params, ln_eps=LN_EPS):
    """Pure-JAX reference (mirrors the kernel's bf16 casts of x/W/pos_table)."""
    S, P = x.shape[0], x.shape[1]
    patch_dim = x.shape[2] * x.shape[3] * x.shape[4]
    x_flat = x.reshape(S * P, patch_dim).astype(jnp.bfloat16).astype(jnp.float32)
    w = params["patch_w"].astype(jnp.bfloat16).astype(jnp.float32)
    pos_tab = params["pos_table"].astype(jnp.bfloat16).astype(jnp.float32)
    y = x_flat @ w + params["patch_b"]
    y = y + jnp.take(pos_tab, position_ids.reshape(-1), axis=0)
    mean = jnp.mean(y, axis=-1, keepdims=True)
    var = jnp.mean((y - mean) ** 2, axis=-1, keepdims=True)
    y = (y - mean) / jnp.sqrt(var + ln_eps)
    y = y * params["ln_gamma"] + params["ln_beta"]
    return y.reshape(S, P, -1)


if __name__ == "__main__":
    key = jax.random.PRNGKey(0)
    kx, kp, kparams = jax.random.split(key, 3)

    seq_len, num_patches, C, H, W = 8, 4, 3, 8, 8   # patch_dim = 3*8*8 = 192
    llm_dim = 128
    max_embeds = 16
    patch_dim = C * H * W

    x = jax.random.normal(kx, (seq_len, num_patches, C, H, W), jnp.float32)
    position_ids = jax.random.randint(kp, (seq_len, num_patches), 0, max_embeds,
                                      dtype=jnp.int32)
    params = init_params(kparams, patch_dim, llm_dim, max_embeds)

    out = input_embeddings(x, position_ids, params)   # bf16 output by default
    out = jax.block_until_ready(out)

    ref = _reference(x, position_ids, params)
    assert out.shape == (seq_len, num_patches, llm_dim)
    out_f32 = out.astype(jnp.float32)
    assert jnp.allclose(out_f32, ref, atol=3e-2, rtol=3e-2), (
        float(jnp.max(jnp.abs(out_f32 - ref))))

    print("KERNEL_OK")
</pallas_src>

<mosaic_0001>
module attributes {stable_mosaic.version = 11 : i64} {
  func.func @_input_embeddings_kernel(%arg0: i32, %arg1: memref<32x1xi32, #tpu.memory_space<vmem>>, %arg2: memref<32x192xf32, #tpu.memory_space<vmem>>, %arg3: memref<192x128xbf16, #tpu.memory_space<vmem>>, %arg4: memref<16x128xbf16, #tpu.memory_space<vmem>>, %arg5: memref<3x128xf32, #tpu.memory_space<vmem>>, %arg6: memref<32x128xbf16, #tpu.memory_space<vmem>>) attributes {dimension_semantics = [#tpu.dimension_semantics<parallel>], iteration_bounds = array<i64: 1>, scalar_prefetch = 0 : i64, scratch_operands = 0 : i64, tpu.core_type = #tpu.core_type<tc>, window_params = [{transform_indices = @transform_0, window_bounds = array<i64: 32, 1>}, {transform_indices = @transform_1, window_bounds = array<i64: 32, 192>}, {pipeline_mode = #tpu.pipeline_mode<synchronous>, transform_indices = @transform_2, window_bounds = array<i64: 192, 128>}, {pipeline_mode = #tpu.pipeline_mode<synchronous>, transform_indices = @transform_3, window_bounds = array<i64: 16, 128>}, {pipeline_mode = #tpu.pipeline_mode<synchronous>, transform_indices = @transform_4, window_bounds = array<i64: 3, 128>}, {transform_indices = @transform_5, window_bounds = array<i64: 32, 128>}]} {
    %c0 = arith.constant 0 : index
    %c0_0 = arith.constant 0 : index
    %0 = vector.load %arg2[%c0, %c0_0] : memref<32x192xf32, #tpu.memory_space<vmem>>, vector<32x192xf32>
    %1 = arith.truncf %0 : vector<32x192xf32> to vector<32x192xbf16>
    %c0_1 = arith.constant 0 : index
    %c0_2 = arith.constant 0 : index
    %2 = vector.load %arg3[%c0_1, %c0_2] : memref<192x128xbf16, #tpu.memory_space<vmem>>, vector<192x128xbf16>
    %cst = arith.constant dense<0.000000e+00> : vector<32x128xf32>
    %3 = tpu.matmul %1, %2, %cst {dimension_numbers = #tpu.dot_dimension_numbers<[1], [0], [0], [1], [0, 0, 1, 1], [], []>} : vector<32x192xbf16>, vector<192x128xbf16>, vector<32x128xf32> -> vector<32x128xf32>
    %c0_3 = arith.constant 0 : index
    %c0_4 = arith.constant 0 : index
    %4 = vector.load %arg1[%c0_3, %c0_4] : memref<32x1xi32, #tpu.memory_space<vmem>>, vector<32x1xi32>
    %c0_i32 = arith.constant 0 : i32
    %c15_i32 = arith.constant 15 : i32
    %5 = vector.broadcast %c0_i32 : i32 to vector<32x1xi32>
    %6 = arith.maxsi %5, %4 : vector<32x1xi32>
    %7 = vector.broadcast %c15_i32 : i32 to vector<32x1xi32>
    %8 = arith.minsi %7, %6 : vector<32x1xi32>
    %9 = tpu.iota {dimensions = array<i32: 1>} : vector<32x16xi32>
    %10 = vector.broadcast %8 : vector<32x1xi32> to vector<32x16xi32>
    %11 = arith.cmpi eq, %9, %10 : vector<32x16xi32>
    %12 = arith.extui %11 : vector<32x16xi1> to vector<32x16xi32>
    %13 = arith.sitofp %12 : vector<32x16xi32> to vector<32x16xf32>
    %14 = arith.truncf %13 : vector<32x16xf32> to vector<32x16xbf16>
    %c0_5 = arith.constant 0 : index
    %c0_6 = arith.constant 0 : index
    %15 = vector.load %arg4[%c0_5, %c0_6] : memref<16x128xbf16, #tpu.memory_space<vmem>>, vector<16x128xbf16>
    %cst_7 = arith.constant dense<0.000000e+00> : vector<32x128xf32>
    %16 = tpu.matmul %14, %15, %cst_7 {dimension_numbers = #tpu.dot_dimension_numbers<[1], [0], [0], [1], [0, 0, 1, 1], [], []>} : vector<32x16xbf16>, vector<16x128xbf16>, vector<32x128xf32> -> vector<32x128xf32>
    %c0_8 = arith.constant 0 : index
    %c0_9 = arith.constant 0 : index
    %17 = vector.load %arg5[%c0_8, %c0_9] : memref<3x128xf32, #tpu.memory_space<vmem>>, vector<1x128xf32>
    %c1 = arith.constant 1 : index
    %c0_10 = arith.constant 0 : index
    %18 = vector.load %arg5[%c1, %c0_10] : memref<3x128xf32, #tpu.memory_space<vmem>>, vector<1x128xf32>
    %c2 = arith.constant 2 : index
    %c0_11 = arith.constant 0 : index
    %19 = vector.load %arg5[%c2, %c0_11] : memref<3x128xf32, #tpu.memory_space<vmem>>, vector<1x128xf32>
    %20 = vector.broadcast %17 : vector<1x128xf32> to vector<32x128xf32>
    %21 = arith.addf %3, %20 : vector<32x128xf32>
    %22 = arith.addf %21, %16 : vector<32x128xf32>
    %cst_12 = arith.constant dense<0.000000e+00> : vector<32xf32>
    %23 = vector.multi_reduction <add>, %22, %cst_12 [1] : vector<32x128xf32> to vector<32xf32>
    %24 = vector.shape_cast %23 : vector<32xf32> to vector<32x1xf32>
    %25 = arith.mulf %22, %22 : vector<32x128xf32>
    %cst_13 = arith.constant dense<0.000000e+00> : vector<32xf32>
    %26 = vector.multi_reduction <add>, %25, %cst_13 [1] : vector<32x128xf32> to vector<32xf32>
    %27 = vector.shape_cast %26 : vector<32xf32> to vector<32x1xf32>
    %cst_14 = arith.constant 1.280000e+02 : f32
    %28 = vector.broadcast %cst_14 : f32 to vector<32x1xf32>
    %29 = arith.divf %24, %28 : vector<32x1xf32>
    %cst_15 = arith.constant 1.280000e+02 : f32
    %30 = vector.broadcast %cst_15 : f32 to vector<32x1xf32>
    %31 = arith.divf %27, %30 : vector<32x1xf32>
    %32 = arith.mulf %29, %29 : vector<32x1xf32>
    %33 = arith.subf %31, %32 : vector<32x1xf32>
    %cst_16 = arith.constant 0.000000e+00 : f32
    %34 = vector.broadcast %cst_16 : f32 to vector<32x1xf32>
    %35 = arith.maximumf %33, %34 : vector<32x1xf32>
    %36 = vector.broadcast %29 : vector<32x1xf32> to vector<32x128xf32>
    %37 = arith.subf %22, %36 : vector<32x128xf32>
    %cst_17 = arith.constant 9.99999974E-6 : f32
    %38 = vector.broadcast %cst_17 : f32 to vector<32x1xf32>
    %39 = arith.addf %35, %38 : vector<32x1xf32>
    %40 = math.rsqrt %39 : vector<32x1xf32>
    %41 = vector.broadcast %40 : vector<32x1xf32> to vector<32x128xf32>
    %42 = arith.mulf %37, %41 : vector<32x128xf32>
    %43 = vector.broadcast %18 : vector<1x128xf32> to vector<32x128xf32>
    %44 = arith.mulf %42, %43 : vector<32x128xf32>
    %45 = vector.broadcast %19 : vector<1x128xf32> to vector<32x128xf32>
    %46 = arith.addf %44, %45 : vector<32x128xf32>
    %47 = arith.truncf %46 : vector<32x128xf32> to vector<32x128xbf16>
    %c0_18 = arith.constant 0 : index
    %c0_19 = arith.constant 0 : index
    %48 = vector.load %arg6[%c0_18, %c0_19] : memref<32x128xbf16, #tpu.memory_space<vmem>>, vector<32x128xbf16>
    tpu.vector_store %arg6[%c0_18, %c0_19], %47 {strides = array<i32>} : memref<32x128xbf16, #tpu.memory_space<vmem>>, vector<32x128xbf16>,
    return
  }
  func.func @transform_0(%arg0: i32) -> (i32, i32) {
    %c0_i32 = arith.constant 0 : i32
    %c0_i32_0 = arith.constant 0 : i32
    return %arg0, %c0_i32 : i32, i32
  }
  func.func @transform_1(%arg0: i32) -> (i32, i32) {
    %c0_i32 = arith.constant 0 : i32
    %c0_i32_0 = arith.constant 0 : i32
    return %arg0, %c0_i32 : i32, i32
  }
  func.func @transform_2(%arg0: i32) -> (i32, i32) {
    %c0_i32 = arith.constant 0 : i32
    %c0_i32_0 = arith.constant 0 : i32
    %c0_i32_1 = arith.constant 0 : i32
    return %c0_i32, %c0_i32_0 : i32, i32
  }
  func.func @transform_3(%arg0: i32) -> (i32, i32) {
    %c0_i32 = arith.constant 0 : i32
    %c0_i32_0 = arith.constant 0 : i32
    %c0_i32_1 = arith.constant 0 : i32
    return %c0_i32, %c0_i32_0 : i32, i32
  }
  func.func @transform_4(%arg0: i32) -> (i32, i32) {
    %c0_i32 = arith.constant 0 : i32
    %c0_i32_0 = arith.constant 0 : i32
    %c0_i32_1 = arith.constant 0 : i32
    return %c0_i32, %c0_i32_0 : i32, i32
  }
  func.func @transform_5(%arg0: i32) -> (i32, i32) {
    %c0_i32 = arith.constant 0 : i32
    %c0_i32_0 = arith.constant 0 : i32
    return %arg0, %c0_i32 : i32, i32
  }
}

module attributes {stable_mosaic.version = 11 : i64} {
  func.func @_input_embeddings_kernel(%arg0: i32, %arg1: memref<32x1xi32, #tpu.memory_space<vmem>>, %arg2: memref<32x192xf32, #tpu.memory_space<vmem>>, %arg3: memref<192x128xbf16, #tpu.memory_space<vmem>>, %arg4: memref<16x128xbf16, #tpu.memory_space<vmem>>, %arg5: memref<3x128xf32, #tpu.memory_space<vmem>>, %arg6: memref<32x128xbf16, #tpu.memory_space<vmem>>) attributes {dimension_semantics = [#tpu.dimension_semantics<parallel>], iteration_bounds = array<i64: 1>, scalar_prefetch = 0 : i64, scratch_operands = 0 : i64, tpu.core_type = #tpu.core_type<tc>, window_params = [{transform_indices = @transform_0, window_bounds = array<i64: 32, 1>}, {transform_indices = @transform_1, window_bounds = array<i64: 32, 192>}, {pipeline_mode = #tpu.pipeline_mode<synchronous>, transform_indices = @transform_2, window_bounds = array<i64: 192, 128>}, {pipeline_mode = #tpu.pipeline_mode<synchronous>, transform_indices = @transform_3, window_bounds = array<i64: 16, 128>}, {pipeline_mode = #tpu.pipeline_mode<synchronous>, transform_indices = @transform_4, window_bounds = array<i64: 3, 128>}, {transform_indices = @transform_5, window_bounds = array<i64: 32, 128>}]} {
    %c0 = arith.constant 0 : index
    %c0_0 = arith.constant 0 : index
    %0 = vector.load %arg2[%c0, %c0_0] : memref<32x192xf32, #tpu.memory_space<vmem>>, vector<32x192xf32>
    %1 = arith.truncf %0 : vector<32x192xf32> to vector<32x192xbf16>
    %c0_1 = arith.constant 0 : index
    %c0_2 = arith.constant 0 : index
    %2 = vector.load %arg3[%c0_1, %c0_2] : memref<192x128xbf16, #tpu.memory_space<vmem>>, vector<192x128xbf16>
    %cst = arith.constant dense<0.000000e+00> : vector<32x128xf32>
    %3 = tpu.matmul %1, %2, %cst {dimension_numbers = #tpu.dot_dimension_numbers<[1], [0], [0], [1], [0, 0, 1, 1], [], []>} : vector<32x192xbf16>, vector<192x128xbf16>, vector<32x128xf32> -> vector<32x128xf32>
    %c0_3 = arith.constant 0 : index
    %c0_4 = arith.constant 0 : index
    %4 = vector.load %arg1[%c0_3, %c0_4] : memref<32x1xi32, #tpu.memory_space<vmem>>, vector<32x1xi32>
    %c0_i32 = arith.constant 0 : i32
    %c15_i32 = arith.constant 15 : i32
    %5 = vector.broadcast %c0_i32 : i32 to vector<32x1xi32>
    %6 = arith.maxsi %5, %4 : vector<32x1xi32>
    %7 = vector.broadcast %c15_i32 : i32 to vector<32x1xi32>
    %8 = arith.minsi %7, %6 : vector<32x1xi32>
    %9 = tpu.iota {dimensions = array<i32: 1>} : vector<32x16xi32>
    %10 = vector.broadcast %8 : vector<32x1xi32> to vector<32x16xi32>
    %11 = arith.cmpi eq, %9, %10 : vector<32x16xi32>
    %12 = arith.extui %11 : vector<32x16xi1> to vector<32x16xi32>
    %13 = arith.sitofp %12 : vector<32x16xi32> to vector<32x16xf32>
    %14 = arith.truncf %13 : vector<32x16xf32> to vector<32x16xbf16>
    %c0_5 = arith.constant 0 : index
    %c0_6 = arith.constant 0 : index
    %15 = vector.load %arg4[%c0_5, %c0_6] : memref<16x128xbf16, #tpu.memory_space<vmem>>, vector<16x128xbf16>
    %cst_7 = arith.constant dense<0.000000e+00> : vector<32x128xf32>
    %16 = tpu.matmul %14, %15, %cst_7 {dimension_numbers = #tpu.dot_dimension_numbers<[1], [0], [0], [1], [0, 0, 1, 1], [], []>} : vector<32x16xbf16>, vector<16x128xbf16>, vector<32x128xf32> -> vector<32x128xf32>
    %c0_8 = arith.constant 0 : index
    %c0_9 = arith.constant 0 : index
    %17 = vector.load %arg5[%c0_8, %c0_9] : memref<3x128xf32, #tpu.memory_space<vmem>>, vector<1x128xf32>
    %c1 = arith.constant 1 : index
    %c0_10 = arith.constant 0 : index
    %18 = vector.load %arg5[%c1, %c0_10] : memref<3x128xf32, #tpu.memory_space<vmem>>, vector<1x128xf32>
    %c2 = arith.constant 2 : index
    %c0_11 = arith.constant 0 : index
    %19 = vector.load %arg5[%c2, %c0_11] : memref<3x128xf32, #tpu.memory_space<vmem>>, vector<1x128xf32>
    %20 = vector.broadcast %17 : vector<1x128xf32> to vector<32x128xf32>
    %21 = arith.addf %3, %20 : vector<32x128xf32>
    %22 = arith.addf %21, %16 : vector<32x128xf32>
    %cst_12 = arith.constant dense<0.000000e+00> : vector<32xf32>
    %23 = vector.multi_reduction <add>, %22, %cst_12 [1] : vector<32x128xf32> to vector<32xf32>
    %24 = vector.shape_cast %23 : vector<32xf32> to vector<32x1xf32>
    %25 = arith.mulf %22, %22 : vector<32x128xf32>
    %cst_13 = arith.constant dense<0.000000e+00> : vector<32xf32>
    %26 = vector.multi_reduction <add>, %25, %cst_13 [1] : vector<32x128xf32> to vector<32xf32>
    %27 = vector.shape_cast %26 : vector<32xf32> to vector<32x1xf32>
    %cst_14 = arith.constant 1.280000e+02 : f32
    %28 = vector.broadcast %cst_14 : f32 to vector<32x1xf32>
    %29 = arith.divf %24, %28 : vector<32x1xf32>
    %cst_15 = arith.constant 1.280000e+02 : f32
    %30 = vector.broadcast %cst_15 : f32 to vector<32x1xf32>
    %31 = arith.divf %27, %30 : vector<32x1xf32>
    %32 = arith.mulf %29, %29 : vector<32x1xf32>
    %33 = arith.subf %31, %32 : vector<32x1xf32>
    %cst_16 = arith.constant 0.000000e+00 : f32
    %34 = vector.broadcast %cst_16 : f32 to vector<32x1xf32>
    %35 = arith.maximumf %33, %34 : vector<32x1xf32>
    %36 = vector.broadcast %29 : vector<32x1xf32> to vector<32x128xf32>
    %37 = arith.subf %22, %36 : vector<32x128xf32>
    %cst_17 = arith.constant 9.99999974E-6 : f32
    %38 = vector.broadcast %cst_17 : f32 to vector<32x1xf32>
    %39 = arith.addf %35, %38 : vector<32x1xf32>
    %40 = math.rsqrt %39 : vector<32x1xf32>
    %41 = vector.broadcast %40 : vector<32x1xf32> to vector<32x128xf32>
    %42 = arith.mulf %37, %41 : vector<32x128xf32>
    %43 = vector.broadcast %18 : vector<1x128xf32> to vector<32x128xf32>
    %44 = arith.mulf %42, %43 : vector<32x128xf32>
    %45 = vector.broadcast %19 : vector<1x128xf32> to vector<32x128xf32>
    %46 = arith.addf %44, %45 : vector<32x128xf32>
    %47 = arith.truncf %46 : vector<32x128xf32> to vector<32x128xbf16>
    %c0_18 = arith.constant 0 : index
    %c0_19 = arith.constant 0 : index
    %48 = vector.load %arg6[%c0_18, %c0_19] : memref<32x128xbf16, #tpu.memory_space<vmem>>, vector<32x128xbf16>
    tpu.vector_store %arg6[%c0_18, %c0_19], %47 {strides = array<i32>} : memref<32x128xbf16, #tpu.memory_space<vmem>>, vector<32x128xbf16>,
    return
  }
  func.func @transform_0(%arg0: i32) -> (i32, i32) {
    %c0_i32 = arith.constant 0 : i32
    %c0_i32_0 = arith.constant 0 : i32
    return %arg0, %c0_i32 : i32, i32
  }
  func.func @transform_1(%arg0: i32) -> (i32, i32) {
    %c0_i32 = arith.constant 0 : i32
    %c0_i32_0 = arith.constant 0 : i32
    return %arg0, %c0_i32 : i32, i32
  }
  func.func @transform_2(%arg0: i32) -> (i32, i32) {
    %c0_i32 = arith.constant 0 : i32
    %c0_i32_0 = arith.constant 0 : i32
    %c0_i32_1 = arith.constant 0 : i32
    return %c0_i32, %c0_i32_0 : i32, i32
  }
  func.func @transform_3(%arg0: i32) -> (i32, i32) {
    %c0_i32 = arith.constant 0 : i32
    %c0_i32_0 = arith.constant 0 : i32
    %c0_i32_1 = arith.constant 0 : i32
    return %c0_i32, %c0_i32_0 : i32, i32
  }
  func.func @transform_4(%arg0: i32) -> (i32, i32) {
    %c0_i32 = arith.constant 0 : i32
    %c0_i32_0 = arith.constant 0 : i32
    %c0_i32_1 = arith.constant 0 : i32
    return %c0_i32, %c0_i32_0 : i32, i32
  }
  func.func @transform_5(%arg0: i32) -> (i32, i32) {
    %c0_i32 = arith.constant 0 : i32
    %c0_i32_0 = arith.constant 0 : i32
    return %arg0, %c0_i32 : i32, i32
  }
}

</mosaic_0001>

<bundles_post_ra>
// kernel: tpu_custom_call.1
= control target key start
LH: loop header
LB: loop body
LE: loop exit
PB: predicated region body
PF: predicated region fallthrough
CT: control target
= control target key end

     0   :  { %10 = vsyncpa [#allocation3], 0  ;;  %s789_s0 = inlined_call_operand.vmem [shape: s32[32,1], index: 0, kind: input, shape index: {}]   ;;  %s790_s1 = inlined_call_operand.hbm [shape: f32[32,192], index: 1, kind: input, shape index: {}]   ;;  %s791_s2 = inlined_call_operand.hbm [shape: bf16[192,128], index: 2, kind: input, shape index: {}]   ;;  %s792_s3 = inlined_call_operand.vmem [shape: bf16[16,128], index: 3, kind: input, shape index: {}]   ;;  %s793_s4 = inlined_call_operand.vmem [shape: f32[3,128], index: 4, kind: input, shape index: {}]   ;;  %s794_s5 = inlined_call_operand.hbm [shape: bf16[32,128], index: 5, kind: output, shape index: {}]  }
   0x1   :  { %11 = vsyncpa [#allocation6], 0 }
   0x2   :  { %12 = vsyncpa [#allocation4], 0  ;;  %s628_s18 = smov [#allocation2]   ;;  %s556_s22 = scalar_lea.hbm %s790_s1, 1024 }
   0x3   :  { %s20_s19 = sshll.u32 %s628_s18, 4  ;;  %p557_p0 = scmp.ne.s32.totalorder %s790_s1, %s556_s22  ;;  %s21_s19 = int_to_ptr.vmem [resolvable:$true] %s20_s19 }
   0x4   :  { %p560_p1 = scmp.lt.u32.totalorder %s556_s22, %s790_s1 }
   0x6   :  { %p562_p2 = pnand %p560_p1, %p557_p0 }
   0x8   :  { %565 = shalt.err (!%p562_p2)
}
   0x9   :  { %s566_s27 = scalar_lea.vmem %s21_s19, 1024  ;;  %p571_p4 = scmp.lt.s32.totalorder %s21_s19, %s21_s19 }
   0xa   :  { %p567_p3 = scmp.ne.s32.totalorder %s21_s19, %s566_s27  ;;  %p572_p5 = scmp.lt.s32.totalorder %s566_s27, %s566_s27 }
   0xc   :  { %p573_p6 = por %p572_p5, %p571_p4 }
   0xe   :  { %p574_p7 = pnand %p573_p6, %p567_p3 }
  0x10   :  { %577 = shalt.err (!%p574_p7)
}
  0x11   :  { %s629_s28 = smov 256   ;;  %s630_s29 = smov 16  }
  0x12   :  { %26 = dma.hbm_to_vmem [thread:$0]  %s790_s1, 1024, %s21_s19, [#allocation3], %s629_s28, %s629_s28, %s630_s29  }
  0x13   :  { %s631_s7 = smov [#allocation5]   ;;  %s578_s11 = scalar_lea.hbm %s791_s2, 1536 }
  0x14   :  { %s32_s8 = sshll.u32 %s631_s7, 4  ;;  %p579_p8 = scmp.ne.s32.totalorder %s791_s2, %s578_s11  ;;  %s33_s8 = int_to_ptr.vmem [resolvable:$true] %s32_s8 }
  0x15   :  { %p582_p9 = scmp.lt.u32.totalorder %s578_s11, %s791_s2 }
  0x17   :  { %p584_p10 = pnand %p582_p9, %p579_p8 }
  0x19   :  { %587 = shalt.err (!%p584_p10)
}
  0x1a   :  { %s588_s16 = scalar_lea.vmem %s33_s8, 1536  ;;  %p593_p12 = scmp.lt.s32.totalorder %s33_s8, %s33_s8 }
  0x1b   :  { %p589_p11 = scmp.ne.s32.totalorder %s33_s8, %s588_s16  ;;  %p594_p13 = scmp.lt.s32.totalorder %s588_s16, %s588_s16 }
  0x1d   :  { %p595_p0 = por %p594_p13, %p593_p12 }
  0x1f   :  { %p596_p1 = pnand %p595_p0, %p589_p11 }
  0x21   :  { %599 = shalt.err (!%p596_p1)
}
  0x22   :  { %s632_s1 = smov 64   ;;  %s633_s17 = smov 4  }
  0x23   :  { %38 = dma.hbm_to_vmem [thread:$0]  %s791_s2, 1536, %s33_s8, [#allocation6], %s632_s1, %s632_s1, %s633_s17  }
  0x24   :  { %622 = dma.done.wait [#allocation3], 1024  }
  0x25   :  { %623 = vsyncadd [#allocation3], 4294966272 }
  0x26   :  { %624 = dma.done.wait [#allocation6], 1536  }
  0x27   :  { %625 = vsyncadd [#allocation6], 4294965760  ;;  %v634_v0 = vmov 0   ;;  %v88_v1 = vld [vmem:[%s789_s0 + $0x10] sm:$0xff]  ;;  %v86_v2 = vld [vmem:[%s789_s0] sm:$0xff]  ;;  %vm277_vm8 = vcmask 523264   ;;  %v106_v32 = vlaneseq }
  0x28   :  { %534 = vset.pattern.permute.xlu1 %v634_v0  ;;  %533 = vset.pattern.permute.xlu0 %v634_v0  ;;  %v89_v3 = vld [vmem:[%s789_s0 + $0x18] sm:$0xff]  ;;  %vm94_vm0 = vcmp.gt.s32.totalorder %v88_v1, 0  ;;  %vm90_vm1 = vcmp.gt.s32.totalorder %v86_v2, 0  ;;  %v87_v4 = vld [vmem:[%s789_s0 + $0x8] sm:$0xff]  ;;  %v709_v9 = vld [vmem:[#allocation5] sm:$0xff]   ;;  %vm142_vm13 = vcmask 130048  }
  0x29   :  { %500 = vmatprep.subr.bf16.mxu1 %v634_v0  ;;  %vm96_vm2 = vcmp.gt.s32.totalorder %v89_v3, 0  ;;  %v95_v5 = vsel %vm94_vm0, %v88_v1, 0  ;;  %v91_v6 = vsel %vm90_vm1, %v86_v2, 0  ;;  %vm92_vm3 = vcmp.gt.s32.totalorder %v87_v4, 0  ;;  %v711_v12 = vld [vmem:[#allocation5 + $0x8] sm:$0xff]   ;;  %v716_v15 = vld [vmem:[#allocation5 + $0x10] sm:$0xff]  }
  0x2a   :  { %v97_v7 = vsel %vm96_vm2, %v89_v3, 0  ;;  %vm102_vm4 = vcmp.lt.s32.totalorder %v95_v5, 15  ;;  %vm98_vm5 = vcmp.lt.s32.totalorder %v91_v6, 15  ;;  %v93_v8 = vsel %vm92_vm3, %v87_v4, 0  ;;  %512 = vmatpush1.bf16.msra.mxu1 %v709_v9  ;;  %v720_v16 = vld [vmem:[#allocation5 + $0x18] sm:$0xff]   ;;  %v546_v17 = vld [vmem:[%s792_s3] sm:$0xff]  }
  0x2b   :  { %vm104_vm6 = vcmp.lt.s32.totalorder %v97_v7, 15  ;;  %v103_v10 = vsel %vm102_vm4, %v95_v5, 15  ;;  %v99_v11 = vsel %vm98_vm5, %v91_v6, 15  ;;  %vm100_vm7 = vcmp.lt.s32.totalorder %v93_v8, 15  ;;  %501 = vmatprep.subr.bf16.mxu1 %v634_v0  ;;  %v55_v18 = vld [vmem:[#allocation2 + $0x28] sm:$0xff]  ;;  %v57_v19 = vld [vmem:[#allocation2 + $0x38] sm:$0xff]  ;;  %494 = vmatprep.subr.bf16.mxu0 %v546_v17 }
  0x2c   :  { %115 = vperm.xlu1 %534, %v103_v10   ;;  %109 = vperm.xlu0 %533, %v99_v11   ;;  %v105_v13 = vsel %vm104_vm6, %v97_v7, 15  ;;  %v101_v14 = vsel %vm100_vm7, %v93_v8, 15  ;;  %v61_v20 = vpack.c.bf16 %v57_v19, %v55_v18  ;;  %v539_v21 = vld [vmem:[#allocation5 + $0x20] sm:$0xff]   ;;  %v540_v22 = vld [vmem:[#allocation5 + $0x28] sm:$0xff]   ;;  %v541_v23 = vld [vmem:[#allocation5 + $0x30] sm:$0xff]   ;;  %v107_v33 = vand.u32 127, %v106_v32 }
  0x2d   :  { %495 = vmatpush3.bf16.msra.mxu0 %v546_v17  ;;  %v542_v24 = vld [vmem:[#allocation5 + $0x38] sm:$0xff]   ;;  %v543_v25 = vld [vmem:[#allocation5 + $0x40] sm:$0xff]   ;;  %v544_v26 = vld [vmem:[#allocation5 + $0x48] sm:$0xff]   ;;  %v635_v40 = vmov 0.0   ;;  %s636_s8 = smov [#allocation7]  }
  0x2e   :  { %513 = vmatpush1.bf16.msra.mxu1 %v711_v12  ;;  %469 = vmatprep.mubr.msk.bf16.mxu1 %vm277_vm8, %v61_v20  ;;  %v545_v27 = vld [vmem:[#allocation5 + $0x50] sm:$0xff]   ;;  %v547_v28 = vld [vmem:[#allocation5 + $0x58] sm:$0xff]   ;;  %v54_v29 = vld [vmem:[#allocation2 + $0x20] sm:$0xff]  ;;  %s435_s9 = sshll.u32 %s636_s8, 4  ;;  %s436_s9 = int_to_ptr.vmem [resolvable:$true] %s435_s9 }
  0x2f   :  { %502 = vmatprep.subr.bf16.mxu1 %v634_v0  ;;  %284 = vmatprep.subr.bf16.mxu0 %v634_v0  ;;  %v56_v30 = vld [vmem:[#allocation2 + $0x30] sm:$0xff]  ;;  %v51_v38 = vld [vmem:[#allocation2 + $0x8] sm:$0xff]  ;;  %v53_v39 = vld [vmem:[#allocation2 + $0x18] sm:$0xff]  ;;  %p605_p3 = scmp.lt.s32.totalorder %s436_s9, %s436_s9 }
  0x30   :  { %118 = vperm.xlu1 %534, %v105_v13   ;;  %112 = vperm.xlu0 %533, %v101_v14   ;;  %v60_v31 = vpack.c.bf16 %v56_v30, %v54_v29  ;;  %v59_v47 = vpack.c.bf16 %v53_v39, %v51_v38  ;;  %v50_v48 = vld [vmem:[#allocation2] sm:$0xff]  ;;  %v52_v49 = vld [vmem:[#allocation2 + $0x10] sm:$0xff] }
  0x31   :  { %v58_v50 = vpack.c.bf16 %v52_v49, %v50_v48  ;;  %v455_v55 = vld [vmem:[%s793_s4] ss:$0 sm:$0xff] }
  0x32   :  { %514 = vmatpush1.bf16.msra.mxu1 %v716_v15 }
  0x33   :  { %503 = vmatprep.subr.bf16.mxu1 %v634_v0 }
  0x36   :  { %515 = vmatpush1.bf16.msra.mxu1 %v720_v16 }
  0x37   :  { %504 = vmatprep.subr.bf16.mxu1 %v634_v0 }
  0x3a   :  { %516 = vmatpush1.bf16.msra.mxu1 %v539_v21 }
  0x3b   :  { %505 = vmatprep.subr.bf16.mxu1 %v634_v0 }
  0x3e   :  { %517 = vmatpush1.bf16.msra.mxu1 %v540_v22 }
  0x3f   :  { %506 = vmatprep.subr.bf16.mxu1 %v634_v0 }
  0x42   :  { %518 = vmatpush1.bf16.msra.mxu1 %v541_v23 }
  0x43   :  { %507 = vmatprep.subr.bf16.mxu1 %v634_v0 }
  0x46   :  { %519 = vmatpush1.bf16.msra.mxu1 %v542_v24 }
  0x47   :  { %508 = vmatprep.subr.bf16.mxu1 %v634_v0 }
  0x4a   :  { %520 = vmatpush1.bf16.msra.mxu1 %v543_v25 }
  0x4b   :  { %509 = vmatprep.subr.bf16.mxu1 %v634_v0 }
  0x4e   :  { %521 = vmatpush1.bf16.msra.mxu1 %v544_v26 }
  0x4f   :  { %510 = vmatprep.subr.bf16.mxu1 %v634_v0 }
  0x52   :  { %522 = vmatpush1.bf16.msra.mxu1 %v545_v27 }
  0x53   :  { %511 = vmatprep.subr.bf16.mxu1 %v634_v0 }
  0x56   :  { %523 = vmatpush1.bf16.msra.mxu1 %v547_v28 }
  0x59   :  { %325 = vmatmul.mubr.bf16.vlgmr.msra.gmra.mrb[0].mxu1 %v60_v31 }
  0xab   :  { %v116_v34 = vpop.permute.xlu1 %115  ;;  %v110_v35 = vpop.permute.xlu0 %109 }
  0xac   :  { %vm122_vm9 = vcmp.eq.s32.totalorder %v107_v33, %v116_v34  ;;  %vm120_vm10 = vcmp.eq.s32.totalorder %v107_v33, %v110_v35 }
  0xad   :  { %v450_v41 = vsel %vm122_vm9, 1.0, %v635_v40  ;;  %v448_v42 = vsel %vm120_vm10, 1.0, %v635_v40 }
  0xaf   :  { %v119_v36 = vpop.permute.xlu1 %118  ;;  %v113_v37 = vpop.permute.xlu0 %112 }
  0xb0   :  { %vm123_vm11 = vcmp.eq.s32.totalorder %v107_v33, %v119_v36  ;;  %vm121_vm12 = vcmp.eq.s32.totalorder %v107_v33, %v113_v37 }
  0xb1   :  { %v451_v43 = vsel %vm123_vm11, 1.0, %v635_v40  ;;  %v449_v44 = vsel %vm121_vm12, 1.0, %v635_v40 }
  0xb2   :  { %v133_v45 = vpack.c.bf16 %v451_v43, %v450_v41  ;;  %v132_v46 = vpack.c.bf16 %v449_v44, %v448_v42 }
  0xb4   :  { %496 = vmatprep.mubr.msk.bf16.mxu0 %vm142_vm13, %v132_v46  ;;  %v470_v46 = vld [vmem:[%s793_s4 + $0x1] ss:$0 sm:$0xff] }
  0xb5   :  { %497 = vmatmul.mubr.msk.bf16.vlgmr.msra.gmra.mrb[0].mxu0 %vm142_vm13, %v133_v45 }
  0xb6   :  { %285 = vmatpush1.bf16.msra.mxu0 %v709_v9  ;;  %468 = vmatprep.mubr.msk.bf16.mxu0 %vm277_vm8, %v59_v47 }
  0xb7   :  { %286 = vmatprep.subr.bf16.mxu0 %v634_v0 }
  0xba   :  { %287 = vmatpush1.bf16.msra.mxu0 %v711_v12 }
  0xbb   :  { %288 = vmatprep.subr.bf16.mxu0 %v634_v0 }
  0xbe   :  { %289 = vmatpush1.bf16.msra.mxu0 %v716_v15 }
  0xbf   :  { %290 = vmatprep.subr.bf16.mxu0 %v634_v0 }
  0xc2   :  { %291 = vmatpush1.bf16.msra.mxu0 %v720_v16 }
  0xc3   :  { %292 = vmatprep.subr.bf16.mxu0 %v634_v0 }
  0xc6   :  { %293 = vmatpush1.bf16.msra.mxu0 %v539_v21 }
  0xc7   :  { %294 = vmatprep.subr.bf16.mxu0 %v634_v0 }
  0xca   :  { %295 = vmatpush1.bf16.msra.mxu0 %v540_v22 }
  0xcb   :  { %296 = vmatprep.subr.bf16.mxu0 %v634_v0 }
  0xce   :  { %297 = vmatpush1.bf16.msra.mxu0 %v541_v23 }
  0xcf   :  { %298 = vmatprep.subr.bf16.mxu0 %v634_v0 }
  0xd2   :  { %299 = vmatpush1.bf16.msra.mxu0 %v542_v24 }
  0xd3   :  { %300 = vmatprep.subr.bf16.mxu0 %v634_v0 }
  0xd6   :  { %301 = vmatpush1.bf16.msra.mxu0 %v543_v25 }
  0xd7   :  { %302 = vmatprep.subr.bf16.mxu0 %v634_v0 }
  0xda   :  { %303 = vmatpush1.bf16.msra.mxu0 %v544_v26 }
  0xdb   :  { %304 = vmatprep.subr.bf16.mxu0 %v634_v0 }
  0xde   :  { %305 = vmatpush1.bf16.msra.mxu0 %v545_v27 }
  0xdf   :  { %306 = vmatprep.subr.bf16.mxu0 %v634_v0 }
  0xe2   :  { %307 = vmatpush1.bf16.msra.mxu0 %v547_v28 }
  0xe5   :  { %317 = vmatmul.mubr.bf16.vlgmr.msra.gmra.mrb[4].mxu0 %v58_v50 }
 0x12c   :  { %v326_v51 = vpop.f32.mrb[0].mxu1 }
 0x12d   :  { %v328_v52 = vpop.f32.mrb[1].mxu1  ;;  %v327_v56 = vadd.f32 %v455_v55, %v326_v51 }
 0x12e   :  { %v329_v53 = vpop.f32.mrb[2].mxu1 }
 0x12f   :  { %v331_v54 = vpop.f32.mrb[3].mxu1  ;;  %v330_v57 = vadd.f32 %v455_v55, %v329_v53 }
 0x130   :  { %v471_v54 = vld [vmem:[%s793_s4 + $0x2] ss:$0 sm:$0xff]  ;;  %s600_s4 = scalar_lea.vmem %s436_s9, 256 }
 0x131   :  { %p601_p2 = scmp.ne.s32.totalorder %s436_s9, %s600_s4  ;;  %p606_p4 = scmp.lt.s32.totalorder %s600_s4, %s600_s4 }
 0x133   :  { %p607_p5 = por %p606_p4, %p605_p3 }
 0x135   :  { %p608_p6 = pnand %p607_p5, %p601_p2 }
 0x188   :  { %v498_v58 = vpop.f32.mrb[0].mxu0 }
 0x189   :  { %v756_v59 = vadd.f32 %v498_v58, %v327_v56  ;;  %v183_v60 = vpop.f32.mrb[1].mxu0 }
 0x18a   :  { %v499_v61 = vpop.f32.mrb[2].mxu0 }
 0x18b   :  { %v758_v62 = vadd.f32 %v499_v61, %v330_v57  ;;  %v186_v63 = vpop.f32.mrb[3].mxu0  ;;  %341 = vadd.xlane.f32.xlu0 %v756_v59  ;;  %v347_v11 = vmul.f32 %v756_v59, %v756_v59 }
 0x18d   :  { %v348_v10 = vmul.f32 %v758_v62, %v758_v62 }
 0x18f   :  { %343 = vadd.xlane.f32.xlu0 %v758_v62 }
 0x1b8   :  { %v318_v0 = vpop.f32.mrb[4].mxu0 }
 0x1b9   :  { %v319_v1 = vadd.f32 %v455_v55, %v318_v0  ;;  %v320_v2 = vpop.f32.mrb[5].mxu0 }
 0x1ba   :  { %v321_v3 = vpop.f32.mrb[6].mxu0 }
 0x1bb   :  { %v333_v4 = vadd.f32 %v319_v1, %v183_v60  ;;  %v322_v5 = vadd.f32 %v455_v55, %v321_v3  ;;  %v323_v6 = vpop.f32.mrb[7].mxu0 }
 0x1bd   :  { %v334_v7 = vadd.f32 %v322_v5, %v186_v63  ;;  %337 = vadd.xlane.f32.xlu0 %v333_v4  ;;  %v345_v9 = vmul.f32 %v333_v4, %v333_v4 }
 0x1bf   :  { %339 = vadd.xlane.f32.xlu1 %v334_v7  ;;  %v346_v8 = vmul.f32 %v334_v7, %v334_v7 }
 0x1c1   :  { %351 = vadd.xlane.f32.xlu0 %v346_v8 }
 0x1c3   :  { %349 = vadd.xlane.f32.xlu1 %v345_v9 }
 0x1c5   :  { %355 = vadd.xlane.f32.xlu0 %v348_v10 }
 0x1c7   :  { %353 = vadd.xlane.f32.xlu1 %v347_v11 }
 0x218   :  { %v342_v12 = vpop.xlane.xlu0 %341 }
 0x219   :  { %v360_v22 = vmul.f32 0.0078125, %v342_v12 }
 0x21b   :  { %v368_v32 = vmul.f32 %v360_v22, %v360_v22  ;;  %v380_v55 = vsub.f32 %v756_v59, %v360_v22 }
 0x21c   :  { %v344_v13 = vpop.xlane.xlu0 %343 }
 0x21d   :  { %v361_v19 = vmul.f32 0.0078125, %v344_v13 }
 0x21f   :  { %v369_v28 = vmul.f32 %v361_v19, %v361_v19  ;;  %v381_v50 = vsub.f32 %v758_v62, %v361_v19 }
 0x24a   :  { %v338_v14 = vpop.xlane.xlu0 %337 }
 0x24b   :  { %v358_v16 = vmul.f32 0.0078125, %v338_v14 }
 0x24c   :  { %v340_v15 = vpop.xlane.xlu1 %339 }
 0x24d   :  { %v359_v17 = vmul.f32 0.0078125, %v340_v15  ;;  %v366_v24 = vmul.f32 %v358_v16, %v358_v16  ;;  %v378_v47 = vsub.f32 %v333_v4, %v358_v16 }
 0x24e   :  { %v352_v18 = vpop.xlane.xlu0 %351 }
 0x24f   :  { %v367_v20 = vmul.f32 %v359_v17, %v359_v17  ;;  %v363_v21 = vmul.f32 0.0078125, %v352_v18  ;;  %v379_v44 = vsub.f32 %v334_v7, %v359_v17 }
 0x250   :  { %v350_v23 = vpop.xlane.xlu1 %349 }
 0x251   :  { %v371_v25 = vsub.f32 %v363_v21, %v367_v20  ;;  %v362_v26 = vmul.f32 0.0078125, %v350_v23 }
 0x252   :  { %v356_v27 = vpop.xlane.xlu0 %355 }
 0x253   :  { %v375_v29 = vmax.f32 %v371_v25, 0.0  ;;  %v370_v30 = vsub.f32 %v362_v26, %v366_v24  ;;  %v365_v31 = vmul.f32 0.0078125, %v356_v27 }
 0x254   :  { %v354_v33 = vpop.xlane.xlu1 %353 }
 0x255   :  { %v383_v34 = vadd.f32 1e-05, %v375_v29  ;;  %v374_v35 = vmax.f32 %v370_v30, 0.0  ;;  %v373_v36 = vsub.f32 %v365_v31, %v369_v28  ;;  %v364_v37 = vmul.f32 0.0078125, %v354_v33 }
 0x257   :  { %548 = vrsqrt.f32 %v383_v34  ;;  %v382_v38 = vadd.f32 1e-05, %v374_v35  ;;  %v377_v39 = vmax.f32 %v373_v36, 0.0  ;;  %v372_v40 = vsub.f32 %v364_v37, %v368_v32 }
 0x259   :  { %550 = vrsqrt.f32 %v382_v38  ;;  %v385_v41 = vadd.f32 1e-05, %v377_v39  ;;  %v376_v42 = vmax.f32 %v372_v40, 0.0 }
 0x25b   :  { %552 = vrsqrt.f32 %v385_v41  ;;  %v384_v43 = vadd.f32 1e-05, %v376_v42 }
 0x25d   :  { %554 = vrsqrt.f32 %v384_v43 }
 0x261   :  { %v549_v45 = vpop.eup %548 }
 0x262   :  { %v391_v48 = vmul.f32 %v549_v45, %v379_v44 }
 0x263   :  { %v551_v49 = vpop.eup %550 }
 0x264   :  { %v390_v51 = vmul.f32 %v551_v49, %v378_v47  ;;  %v399_v52 = vmul.f32 %v470_v46, %v391_v48 }
 0x265   :  { %v553_v53 = vpop.eup %552 }
 0x266   :  { %v393_v56 = vmul.f32 %v553_v53, %v381_v50  ;;  %v398_v57 = vmul.f32 %v470_v46, %v390_v51  ;;  %v407_v0 = vadd.f32 %v471_v54, %v399_v52 }
 0x267   :  { %v555_v58 = vpop.eup %554 }
 0x268   :  { %v392_v60 = vmul.f32 %v555_v58, %v380_v55  ;;  %v401_v61 = vmul.f32 %v470_v46, %v393_v56  ;;  %v406_v63 = vadd.f32 %v471_v54, %v398_v57 }
 0x26a   :  { %v400_v1 = vmul.f32 %v470_v46, %v392_v60  ;;  %v483_v2 = vpack.c.bf16 %v407_v0, %v406_v63  ;;  %v409_v3 = vadd.f32 %v471_v54, %v401_v61 }
 0x26c   :  { %v408_v62 = vadd.f32 %v471_v54, %v400_v1  ;;  %484 = vst [vmem:[#allocation7] sm:$0xff] %v483_v2  }
 0x26e   :  { %v488_v4 = vpack.c.bf16 %v409_v3, %v408_v62 }
 0x270   :  { %490 = vst [vmem:[#allocation7 + $0x8] sm:$0xff] %v488_v4  }
 0x271   :  { %611 = shalt.err (!%p608_p6)
}
 0x272   :  { %s612_s12 = scalar_lea.hbm %s794_s5, 256 }
 0x273   :  { %p613_p7 = scmp.ne.s32.totalorder %s794_s5, %s612_s12  ;;  %p616_p8 = scmp.lt.u32.totalorder %s612_s12, %s794_s5 }
 0x275   :  { %p618_p9 = pnand %p616_p8, %p613_p7 }
 0x277   :  { %621 = shalt.err (!%p618_p9)
}
 0x278   :  { %441 = dma.vmem_to_hbm [thread:$0]  %s436_s9, 256, %s794_s5, [#allocation4], %s632_s1, %s632_s1, %s633_s17  }
 0x279   :  { %626 = dma.done.wait [#allocation4], 256  }
 0x27a   :  { %627 = vsyncadd [#allocation4], 4294967040 }
 0x27b   :  { %445 = vsyncpa [#allocation3], 1 }
 0x27c   :  { %446 = vsyncpa [#allocation6], 1 }
 0x27d   :  { %447 = vsyncpa [#allocation4], 1 }

// kernel: tpu_custom_call.1
= control target key start
LH: loop header
LB: loop body
LE: loop exit
PB: predicated region body
PF: predicated region fallthrough
CT: control target
= control target key end

     0   :  { %10 = vsyncpa [#allocation3], 0  ;;  %s789_s0 = inlined_call_operand.vmem [shape: s32[32,1], index: 0, kind: input, shape index: {}]   ;;  %s790_s1 = inlined_call_operand.hbm [shape: f32[32,192], index: 1, kind: input, shape index: {}]   ;;  %s791_s2 = inlined_call_operand.hbm [shape: bf16[192,128], index: 2, kind: input, shape index: {}]   ;;  %s792_s3 = inlined_call_operand.vmem [shape: bf16[16,128], index: 3, kind: input, shape index: {}]   ;;  %s793_s4 = inlined_call_operand.vmem [shape: f32[3,128], index: 4, kind: input, shape index: {}]   ;;  %s794_s5 = inlined_call_operand.hbm [shape: bf16[32,128], index: 5, kind: output, shape index: {}]  }
   0x1   :  { %11 = vsyncpa [#allocation6], 0 }
   0x2   :  { %12 = vsyncpa [#allocation4], 0  ;;  %s628_s18 = smov [#allocation2]   ;;  %s556_s22 = scalar_lea.hbm %s790_s1, 1024 }
   0x3   :  { %s20_s19 = sshll.u32 %s628_s18, 4  ;;  %p557_p0 = scmp.ne.s32.totalorder %s790_s1, %s556_s22  ;;  %s21_s19 = int_to_ptr.vmem [resolvable:$true] %s20_s19 }
   0x4   :  { %p560_p1 = scmp.lt.u32.totalorder %s556_s22, %s790_s1 }
   0x6   :  { %p562_p2 = pnand %p560_p1, %p557_p0 }
   0x8   :  { %565 = shalt.err (!%p562_p2)
}
   0x9   :  { %s566_s27 = scalar_lea.vmem %s21_s19, 1024  ;;  %p571_p4 = scmp.lt.s32.totalorder %s21_s19, %s21_s19 }
   0xa   :  { %p567_p3 = scmp.ne.s32.totalorder %s21_s19, %s566_s27  ;;  %p572_p5 = scmp.lt.s32.totalorder %s566_s27, %s566_s27 }
   0xc   :  { %p573_p6 = por %p572_p5, %p571_p4 }
   0xe   :  { %p574_p7 = pnand %p573_p6, %p567_p3 }
  0x10   :  { %577 = shalt.err (!%p574_p7)
}
  0x11   :  { %s629_s28 = smov 256   ;;  %s630_s29 = smov 16  }
  0x12   :  { %26 = dma.hbm_to_vmem [thread:$0]  %s790_s1, 1024, %s21_s19, [#allocation3], %s629_s28, %s629_s28, %s630_s29  }
  0x13   :  { %s631_s7 = smov [#allocation5]   ;;  %s578_s11 = scalar_lea.hbm %s791_s2, 1536 }
  0x14   :  { %s32_s8 = sshll.u32 %s631_s7, 4  ;;  %p579_p8 = scmp.ne.s32.totalorder %s791_s2, %s578_s11  ;;  %s33_s8 = int_to_ptr.vmem [resolvable:$true] %s32_s8 }
  0x15   :  { %p582_p9 = scmp.lt.u32.totalorder %s578_s11, %s791_s2 }
  0x17   :  { %p584_p10 = pnand %p582_p9, %p579_p8 }
  0x19   :  { %587 = shalt.err (!%p584_p10)
}
  0x1a   :  { %s588_s16 = scalar_lea.vmem %s33_s8, 1536  ;;  %p593_p12 = scmp.lt.s32.totalorder %s33_s8, %s33_s8 }
  0x1b   :  { %p589_p11 = scmp.ne.s32.totalorder %s33_s8, %s588_s16  ;;  %p594_p13 = scmp.lt.s32.totalorder %s588_s16, %s588_s16 }
  0x1d   :  { %p595_p0 = por %p594_p13, %p593_p12 }
  0x1f   :  { %p596_p1 = pnand %p595_p0, %p589_p11 }
  0x21   :  { %599 = shalt.err (!%p596_p1)
}
  0x22   :  { %s632_s1 = smov 64   ;;  %s633_s17 = smov 4  }
  0x23   :  { %38 = dma.hbm_to_vmem [thread:$0]  %s791_s2, 1536, %s33_s8, [#allocation6], %s632_s1, %s632_s1, %s633_s17  }
  0x24   :  { %622 = dma.done.wait [#allocation3], 1024  }
  0x25   :  { %623 = vsyncadd [#allocation3], 4294966272 }
  0x26   :  { %624 = dma.done.wait [#allocation6], 1536  }
  0x27   :  { %625 = vsyncadd [#allocation6], 4294965760  ;;  %v634_v0 = vmov 0   ;;  %v88_v1 = vld [vmem:[%s789_s0 + $0x10] sm:$0xff]  ;;  %v86_v2 = vld [vmem:[%s789_s0] sm:$0xff]  ;;  %vm277_vm8 = vcmask 523264   ;;  %v106_v32 = vlaneseq }
  0x28   :  { %534 = vset.pattern.permute.xlu1 %v634_v0  ;;  %533 = vset.pattern.permute.xlu0 %v634_v0  ;;  %v89_v3 = vld [vmem:[%s789_s0 + $0x18] sm:$0xff]  ;;  %vm94_vm0 = vcmp.gt.s32.totalorder %v88_v1, 0  ;;  %vm90_vm1 = vcmp.gt.s32.totalorder %v86_v2, 0  ;;  %v87_v4 = vld [vmem:[%s789_s0 + $0x8] sm:$0xff]  ;;  %v709_v9 = vld [vmem:[#allocation5] sm:$0xff]   ;;  %vm142_vm13 = vcmask 130048  }
  0x29   :  { %500 = vmatprep.subr.bf16.mxu1 %v634_v0  ;;  %vm96_vm2 = vcmp.gt.s32.totalorder %v89_v3, 0  ;;  %v95_v5 = vsel %vm94_vm0, %v88_v1, 0  ;;  %v91_v6 = vsel %vm90_vm1, %v86_v2, 0  ;;  %vm92_vm3 = vcmp.gt.s32.totalorder %v87_v4, 0  ;;  %v711_v12 = vld [vmem:[#allocation5 + $0x8] sm:$0xff]   ;;  %v716_v15 = vld [vmem:[#allocation5 + $0x10] sm:$0xff]  }
  0x2a   :  { %v97_v7 = vsel %vm96_vm2, %v89_v3, 0  ;;  %vm102_vm4 = vcmp.lt.s32.totalorder %v95_v5, 15  ;;  %vm98_vm5 = vcmp.lt.s32.totalorder %v91_v6, 15  ;;  %v93_v8 = vsel %vm92_vm3, %v87_v4, 0  ;;  %512 = vmatpush1.bf16.msra.mxu1 %v709_v9  ;;  %v720_v16 = vld [vmem:[#allocation5 + $0x18] sm:$0xff]   ;;  %v546_v17 = vld [vmem:[%s792_s3] sm:$0xff]  }
  0x2b   :  { %vm104_vm6 = vcmp.lt.s32.totalorder %v97_v7, 15  ;;  %v103_v10 = vsel %vm102_vm4, %v95_v5, 15  ;;  %v99_v11 = vsel %vm98_vm5, %v91_v6, 15  ;;  %vm100_vm7 = vcmp.lt.s32.totalorder %v93_v8, 15  ;;  %501 = vmatprep.subr.bf16.mxu1 %v634_v0  ;;  %v55_v18 = vld [vmem:[#allocation2 + $0x28] sm:$0xff]  ;;  %v57_v19 = vld [vmem:[#allocation2 + $0x38] sm:$0xff]  ;;  %494 = vmatprep.subr.bf16.mxu0 %v546_v17 }
  0x2c   :  { %115 = vperm.xlu1 %534, %v103_v10   ;;  %109 = vperm.xlu0 %533, %v99_v11   ;;  %v105_v13 = vsel %vm104_vm6, %v97_v7, 15  ;;  %v101_v14 = vsel %vm100_vm7, %v93_v8, 15  ;;  %v61_v20 = vpack.c.bf16 %v57_v19, %v55_v18  ;;  %v539_v21 = vld [vmem:[#allocation5 + $0x20] sm:$0xff]   ;;  %v540_v22 = vld [vmem:[#allocation5 + $0x28] sm:$0xff]   ;;  %v541_v23 = vld [vmem:[#allocation5 + $0x30] sm:$0xff]   ;;  %v107_v33 = vand.u32 127, %v106_v32 }
  0x2d   :  { %495 = vmatpush3.bf16.msra.mxu0 %v546_v17  ;;  %v542_v24 = vld [vmem:[#allocation5 + $0x38] sm:$0xff]   ;;  %v543_v25 = vld [vmem:[#allocation5 + $0x40] sm:$0xff]   ;;  %v544_v26 = vld [vmem:[#allocation5 + $0x48] sm:$0xff]   ;;  %v635_v40 = vmov 0.0   ;;  %s636_s8 = smov [#allocation7]  }
  0x2e   :  { %513 = vmatpush1.bf16.msra.mxu1 %v711_v12  ;;  %469 = vmatprep.mubr.msk.bf16.mxu1 %vm277_vm8, %v61_v20  ;;  %v545_v27 = vld [vmem:[#allocation5 + $0x50] sm:$0xff]   ;;  %v547_v28 = vld [vmem:[#allocation5 + $0x58] sm:$0xff]   ;;  %v54_v29 = vld [vmem:[#allocation2 + $0x20] sm:$0xff]  ;;  %s435_s9 = sshll.u32 %s636_s8, 4  ;;  %s436_s9 = int_to_ptr.vmem [resolvable:$true] %s435_s9 }
  0x2f   :  { %502 = vmatprep.subr.bf16.mxu1 %v634_v0  ;;  %284 = vmatprep.subr.bf16.mxu0 %v634_v0  ;;  %v56_v30 = vld [vmem:[#allocation2 + $0x30] sm:$0xff]  ;;  %v51_v38 = vld [vmem:[#allocation2 + $0x8] sm:$0xff]  ;;  %v53_v39 = vld [vmem:[#allocation2 + $0x18] sm:$0xff]  ;;  %p605_p3 = scmp.lt.s32.totalorder %s436_s9, %s436_s9 }
  0x30   :  { %118 = vperm.xlu1 %534, %v105_v13   ;;  %112 = vperm.xlu0 %533, %v101_v14   ;;  %v60_v31 = vpack.c.bf16 %v56_v30, %v54_v29  ;;  %v59_v47 = vpack.c.bf16 %v53_v39, %v51_v38  ;;  %v50_v48 = vld [vmem:[#allocation2] sm:$0xff]  ;;  %v52_v49 = vld [vmem:[#allocation2 + $0x10] sm:$0xff] }
  0x31   :  { %v58_v50 = vpack.c.bf16 %v52_v49, %v50_v48  ;;  %v455_v55 = vld [vmem:[%s793_s4] ss:$0 sm:$0xff] }
  0x32   :  { %514 = vmatpush1.bf16.msra.mxu1 %v716_v15 }
  0x33   :  { %503 = vmatprep.subr.bf16.mxu1 %v634_v0 }
  0x36   :  { %515 = vmatpush1.bf16.msra.mxu1 %v720_v16 }
  0x37   :  { %504 = vmatprep.subr.bf16.mxu1 %v634_v0 }
  0x3a   :  { %516 = vmatpush1.bf16.msra.mxu1 %v539_v21 }
  0x3b   :  { %505 = vmatprep.subr.bf16.mxu1 %v634_v0 }
  0x3e   :  { %517 = vmatpush1.bf16.msra.mxu1 %v540_v22 }
  0x3f   :  { %506 = vmatprep.subr.bf16.mxu1 %v634_v0 }
  0x42   :  { %518 = vmatpush1.bf16.msra.mxu1 %v541_v23 }
  0x43   :  { %507 = vmatprep.subr.bf16.mxu1 %v634_v0 }
  0x46   :  { %519 = vmatpush1.bf16.msra.mxu1 %v542_v24 }
  0x47   :  { %508 = vmatprep.subr.bf16.mxu1 %v634_v0 }
  0x4a   :  { %520 = vmatpush1.bf16.msra.mxu1 %v543_v25 }
  0x4b   :  { %509 = vmatprep.subr.bf16.mxu1 %v634_v0 }
  0x4e   :  { %521 = vmatpush1.bf16.msra.mxu1 %v544_v26 }
  0x4f   :  { %510 = vmatprep.subr.bf16.mxu1 %v634_v0 }
  0x52   :  { %522 = vmatpush1.bf16.msra.mxu1 %v545_v27 }
  0x53   :  { %511 = vmatprep.subr.bf16.mxu1 %v634_v0 }
  0x56   :  { %523 = vmatpush1.bf16.msra.mxu1 %v547_v28 }
  0x59   :  { %325 = vmatmul.mubr.bf16.vlgmr.msra.gmra.mrb[0].mxu1 %v60_v31 }
  0xab   :  { %v116_v34 = vpop.permute.xlu1 %115  ;;  %v110_v35 = vpop.permute.xlu0 %109 }
  0xac   :  { %vm122_vm9 = vcmp.eq.s32.totalorder %v107_v33, %v116_v34  ;;  %vm120_vm10 = vcmp.eq.s32.totalorder %v107_v33, %v110_v35 }
  0xad   :  { %v450_v41 = vsel %vm122_vm9, 1.0, %v635_v40  ;;  %v448_v42 = vsel %vm120_vm10, 1.0, %v635_v40 }
  0xaf   :  { %v119_v36 = vpop.permute.xlu1 %118  ;;  %v113_v37 = vpop.permute.xlu0 %112 }
  0xb0   :  { %vm123_vm11 = vcmp.eq.s32.totalorder %v107_v33, %v119_v36  ;;  %vm121_vm12 = vcmp.eq.s32.totalorder %v107_v33, %v113_v37 }
  0xb1   :  { %v451_v43 = vsel %vm123_vm11, 1.0, %v635_v40  ;;  %v449_v44 = vsel %vm121_vm12, 1.0, %v635_v40 }
  0xb2   :  { %v133_v45 = vpack.c.bf16 %v451_v43, %v450_v41  ;;  %v132_v46 = vpack.c.bf16 %v449_v44, %v448_v42 }
  0xb4   :  { %496 = vmatprep.mubr.msk.bf16.mxu0 %vm142_vm13, %v132_v46  ;;  %v470_v46 = vld [vmem:[%s793_s4 + $0x1] ss:$0 sm:$0xff] }
  0xb5   :  { %497 = vmatmul.mubr.msk.bf16.vlgmr.msra.gmra.mrb[0].mxu0 %vm142_vm13, %v133_v45 }
  0xb6   :  { %285 = vmatpush1.bf16.msra.mxu0 %v709_v9  ;;  %468 = vmatprep.mubr.msk.bf16.mxu0 %vm277_vm8, %v59_v47 }
  0xb7   :  { %286 = vmatprep.subr.bf16.mxu0 %v634_v0 }
  0xba   :  { %287 = vmatpush1.bf16.msra.mxu0 %v711_v12 }
  0xbb   :  { %288 = vmatprep.subr.bf16.mxu0 %v634_v0 }
  0xbe   :  { %289 = vmatpush1.bf16.msra.mxu0 %v716_v15 }
  0xbf   :  { %290 = vmatprep.subr.bf16.mxu0 %v634_v0 }
  0xc2   :  { %291 = vmatpush1.bf16.msra.mxu0 %v720_v16 }
  0xc3   :  { %292 = vmatprep.subr.bf16.mxu0 %v634_v0 }
  0xc6   :  { %293 = vmatpush1.bf16.msra.mxu0 %v539_v21 }
  0xc7   :  { %294 = vmatprep.subr.bf16.mxu0 %v634_v0 }
  0xca   :  { %295 = vmatpush1.bf16.msra.mxu0 %v540_v22 }
  0xcb   :  { %296 = vmatprep.subr.bf16.mxu0 %v634_v0 }
  0xce   :  { %297 = vmatpush1.bf16.msra.mxu0 %v541_v23 }
  0xcf   :  { %298 = vmatprep.subr.bf16.mxu0 %v634_v0 }
  0xd2   :  { %299 = vmatpush1.bf16.msra.mxu0 %v542_v24 }
  0xd3   :  { %300 = vmatprep.subr.bf16.mxu0 %v634_v0 }
  0xd6   :  { %301 = vmatpush1.bf16.msra.mxu0 %v543_v25 }
  0xd7   :  { %302 = vmatprep.subr.bf16.mxu0 %v634_v0 }
  0xda   :  { %303 = vmatpush1.bf16.msra.mxu0 %v544_v26 }
  0xdb   :  { %304 = vmatprep.subr.bf16.mxu0 %v634_v0 }
  0xde   :  { %305 = vmatpush1.bf16.msra.mxu0 %v545_v27 }
  0xdf   :  { %306 = vmatprep.subr.bf16.mxu0 %v634_v0 }
  0xe2   :  { %307 = vmatpush1.bf16.msra.mxu0 %v547_v28 }
  0xe5   :  { %317 = vmatmul.mubr.bf16.vlgmr.msra.gmra.mrb[4].mxu0 %v58_v50 }
 0x12c   :  { %v326_v51 = vpop.f32.mrb[0].mxu1 }
 0x12d   :  { %v328_v52 = vpop.f32.mrb[1].mxu1  ;;  %v327_v56 = vadd.f32 %v455_v55, %v326_v51 }
 0x12e   :  { %v329_v53 = vpop.f32.mrb[2].mxu1 }
 0x12f   :  { %v331_v54 = vpop.f32.mrb[3].mxu1  ;;  %v330_v57 = vadd.f32 %v455_v55, %v329_v53 }
 0x130   :  { %v471_v54 = vld [vmem:[%s793_s4 + $0x2] ss:$0 sm:$0xff]  ;;  %s600_s4 = scalar_lea.vmem %s436_s9, 256 }
 0x131   :  { %p601_p2 = scmp.ne.s32.totalorder %s436_s9, %s600_s4  ;;  %p606_p4 = scmp.lt.s32.totalorder %s600_s4, %s600_s4 }
 0x133   :  { %p607_p5 = por %p606_p4, %p605_p3 }
 0x135   :  { %p608_p6 = pnand %p607_p5, %p601_p2 }
 0x188   :  { %v498_v58 = vpop.f32.mrb[0].mxu0 }
 0x189   :  { %v756_v59 = vadd.f32 %v498_v58, %v327_v56  ;;  %v183_v60 = vpop.f32.mrb[1].mxu0 }
 0x18a   :  { %v499_v61 = vpop.f32.mrb[2].mxu0 }
 0x18b   :  { %v758_v62 = vadd.f32 %v499_v61, %v330_v57  ;;  %v186_v63 = vpop.f32.mrb[3].mxu0  ;;  %341 = vadd.xlane.f32.xlu0 %v756_v59  ;;  %v347_v11 = vmul.f32 %v756_v59, %v756_v59 }
 0x18d   :  { %v348_v10 = vmul.f32 %v758_v62, %v758_v62 }
 0x18f   :  { %343 = vadd.xlane.f32.xlu0 %v758_v62 }
 0x1b8   :  { %v318_v0 = vpop.f32.mrb[4].mxu0 }
 0x1b9   :  { %v319_v1 = vadd.f32 %v455_v55, %v318_v0  ;;  %v320_v2 = vpop.f32.mrb[5].mxu0 }
 0x1ba   :  { %v321_v3 = vpop.f32.mrb[6].mxu0 }
 0x1bb   :  { %v333_v4 = vadd.f32 %v319_v1, %v183_v60  ;;  %v322_v5 = vadd.f32 %v455_v55, %v321_v3  ;;  %v323_v6 = vpop.f32.mrb[7].mxu0 }
 0x1bd   :  { %v334_v7 = vadd.f32 %v322_v5, %v186_v63  ;;  %337 = vadd.xlane.f32.xlu0 %v333_v4  ;;  %v345_v9 = vmul.f32 %v333_v4, %v333_v4 }
 0x1bf   :  { %339 = vadd.xlane.f32.xlu1 %v334_v7  ;;  %v346_v8 = vmul.f32 %v334_v7, %v334_v7 }
 0x1c1   :  { %351 = vadd.xlane.f32.xlu0 %v346_v8 }
 0x1c3   :  { %349 = vadd.xlane.f32.xlu1 %v345_v9 }
 0x1c5   :  { %355 = vadd.xlane.f32.xlu0 %v348_v10 }
 0x1c7   :  { %353 = vadd.xlane.f32.xlu1 %v347_v11 }
 0x218   :  { %v342_v12 = vpop.xlane.xlu0 %341 }
 0x219   :  { %v360_v22 = vmul.f32 0.0078125, %v342_v12 }
 0x21b   :  { %v368_v32 = vmul.f32 %v360_v22, %v360_v22  ;;  %v380_v55 = vsub.f32 %v756_v59, %v360_v22 }
 0x21c   :  { %v344_v13 = vpop.xlane.xlu0 %343 }
 0x21d   :  { %v361_v19 = vmul.f32 0.0078125, %v344_v13 }
 0x21f   :  { %v369_v28 = vmul.f32 %v361_v19, %v361_v19  ;;  %v381_v50 = vsub.f32 %v758_v62, %v361_v19 }
 0x24a   :  { %v338_v14 = vpop.xlane.xlu0 %337 }
 0x24b   :  { %v358_v16 = vmul.f32 0.0078125, %v338_v14 }
 0x24c   :  { %v340_v15 = vpop.xlane.xlu1 %339 }
 0x24d   :  { %v359_v17 = vmul.f32 0.0078125, %v340_v15  ;;  %v366_v24 = vmul.f32 %v358_v16, %v358_v16  ;;  %v378_v47 = vsub.f32 %v333_v4, %v358_v16 }
 0x24e   :  { %v352_v18 = vpop.xlane.xlu0 %351 }
 0x24f   :  { %v367_v20 = vmul.f32 %v359_v17, %v359_v17  ;;  %v363_v21 = vmul.f32 0.0078125, %v352_v18  ;;  %v379_v44 = vsub.f32 %v334_v7, %v359_v17 }
 0x250   :  { %v350_v23 = vpop.xlane.xlu1 %349 }
 0x251   :  { %v371_v25 = vsub.f32 %v363_v21, %v367_v20  ;;  %v362_v26 = vmul.f32 0.0078125, %v350_v23 }
 0x252   :  { %v356_v27 = vpop.xlane.xlu0 %355 }
 0x253   :  { %v375_v29 = vmax.f32 %v371_v25, 0.0  ;;  %v370_v30 = vsub.f32 %v362_v26, %v366_v24  ;;  %v365_v31 = vmul.f32 0.0078125, %v356_v27 }
 0x254   :  { %v354_v33 = vpop.xlane.xlu1 %353 }
 0x255   :  { %v383_v34 = vadd.f32 1e-05, %v375_v29  ;;  %v374_v35 = vmax.f32 %v370_v30, 0.0  ;;  %v373_v36 = vsub.f32 %v365_v31, %v369_v28  ;;  %v364_v37 = vmul.f32 0.0078125, %v354_v33 }
 0x257   :  { %548 = vrsqrt.f32 %v383_v34  ;;  %v382_v38 = vadd.f32 1e-05, %v374_v35  ;;  %v377_v39 = vmax.f32 %v373_v36, 0.0  ;;  %v372_v40 = vsub.f32 %v364_v37, %v368_v32 }
 0x259   :  { %550 = vrsqrt.f32 %v382_v38  ;;  %v385_v41 = vadd.f32 1e-05, %v377_v39  ;;  %v376_v42 = vmax.f32 %v372_v40, 0.0 }
 0x25b   :  { %552 = vrsqrt.f32 %v385_v41  ;;  %v384_v43 = vadd.f32 1e-05, %v376_v42 }
 0x25d   :  { %554 = vrsqrt.f32 %v384_v43 }
 0x261   :  { %v549_v45 = vpop.eup %548 }
 0x262   :  { %v391_v48 = vmul.f32 %v549_v45, %v379_v44 }
 0x263   :  { %v551_v49 = vpop.eup %550 }
 0x264   :  { %v390_v51 = vmul.f32 %v551_v49, %v378_v47  ;;  %v399_v52 = vmul.f32 %v470_v46, %v391_v48 }
 0x265   :  { %v553_v53 = vpop.eup %552 }
 0x266   :  { %v393_v56 = vmul.f32 %v553_v53, %v381_v50  ;;  %v398_v57 = vmul.f32 %v470_v46, %v390_v51  ;;  %v407_v0 = vadd.f32 %v471_v54, %v399_v52 }
 0x267   :  { %v555_v58 = vpop.eup %554 }
 0x268   :  { %v392_v60 = vmul.f32 %v555_v58, %v380_v55  ;;  %v401_v61 = vmul.f32 %v470_v46, %v393_v56  ;;  %v406_v63 = vadd.f32 %v471_v54, %v398_v57 }
 0x26a   :  { %v400_v1 = vmul.f32 %v470_v46, %v392_v60  ;;  %v483_v2 = vpack.c.bf16 %v407_v0, %v406_v63  ;;  %v409_v3 = vadd.f32 %v471_v54, %v401_v61 }
 0x26c   :  { %v408_v62 = vadd.f32 %v471_v54, %v400_v1  ;;  %484 = vst [vmem:[#allocation7] sm:$0xff] %v483_v2  }
 0x26e   :  { %v488_v4 = vpack.c.bf16 %v409_v3, %v408_v62 }
 0x270   :  { %490 = vst [vmem:[#allocation7 + $0x8] sm:$0xff] %v488_v4  }
 0x271   :  { %611 = shalt.err (!%p608_p6)
}
 0x272   :  { %s612_s12 = scalar_lea.hbm %s794_s5, 256 }
 0x273   :  { %p613_p7 = scmp.ne.s32.totalorder %s794_s5, %s612_s12  ;;  %p616_p8 = scmp.lt.u32.totalorder %s612_s12, %s794_s5 }
 0x275   :  { %p618_p9 = pnand %p616_p8, %p613_p7 }
 0x277   :  { %621 = shalt.err (!%p618_p9)
}
 0x278   :  { %441 = dma.vmem_to_hbm [thread:$0]  %s436_s9, 256, %s794_s5, [#allocation4], %s632_s1, %s632_s1, %s633_s17  }
 0x279   :  { %626 = dma.done.wait [#allocation4], 256  }
 0x27a   :  { %627 = vsyncadd [#allocation4], 4294967040 }
 0x27b   :  { %445 = vsyncpa [#allocation3], 1 }
 0x27c   :  { %446 = vsyncpa [#allocation6], 1 }
 0x27d   :  { %447 = vsyncpa [#allocation4], 1 }

</bundles_post_ra>
